<compile_context>
chip_gen: v5e
topology: v5e:2x2
jax: 0.10.0
libtpu: 0.0.40
codegen_flags: <defaults>
</compile_context>

<pallas_src>
import functools

import jax
import jax.numpy as jnp
from jax.experimental import pallas as pl
from jax.experimental.pallas import tpu as pltpu

LANE = 128
SUBLANE = 8

_TARGET_BLOCK_BYTES = 4 * 1024 * 1024    # per-input block; footprint ~= 4x this
_SPLIT_THRESHOLD_BYTES = 1 * 1024 * 1024  # above this, force >= 2 grid steps
_DEFAULT_SCOPED_VMEM = 16 * 1024 * 1024   # most restrictive default (v5e)


def _round_up(x, m):
    return ((x + m - 1) // m) * m


def _mish_kernel(x_ref, o_ref, *, approx):
    # Input was DMA'd in its native dtype; upcast to f32 on the VPU.
    x = x_ref[...].astype(jnp.float32)
    # tanh(softplus(x)) = ((1+e^x)^2 - 1) / ((1+e^x)^2 + 1)
    #                   = t*(t+2) / ((1+t)^2 + 1),   t = e^x
    # Cancellation-free on the negative tail; clamping x at 40 keeps (1+t)^2
    # finite while tanh(softplus(40)) == 1.0 exactly in f32, so mish(x) = x.
    t = jnp.exp(jnp.minimum(x, 40.0))
    num = t * (t + 2.0)
    denom = (1.0 + t) * (1.0 + t) + 1.0
    # approx=True (no Newton refinement) only for sub-32-bit outputs: ~1e-4
    # relative error is far below bf16 output ULP and trims EUP/VPU work on
    # the bf16/v7x case where the kernel stops being purely DMA-bound.
    tsp = num * pl.reciprocal(denom, approx=approx)
    o_ref[...] = (x * tsp).astype(o_ref.dtype)


def _mish_slab(slab):
    """Mish over a 2D slab: (rows, 128) tiled, or (1, rem<128) single block."""
    rows, cols = slab.shape
    dtype = slab.dtype
    itemsize = jnp.dtype(dtype).itemsize
    approx = itemsize < 4
    kernel = functools.partial(_mish_kernel, approx=approx)

    if cols == LANE:
        # Sub-32-bit dtypes pack rows along sublanes: keep row tiles a
        # multiple of the packed tile (8 f32 / 16 bf16 / 32 int8-fp8).
        row_align = SUBLANE * max(1, 4 // itemsize)
        slab_bytes = rows * cols * itemsize
        if slab_bytes <= _SPLIT_THRESHOLD_BYTES:
            tile_rows = rows                      # single full-extent block
        else:
            max_tile_rows = max(
                row_align,
                (_TARGET_BLOCK_BYTES // (LANE * itemsize))
                // row_align * row_align,
            )
            # >= 2 balanced blocks so both v7x TensorCores get work; larger
            # slabs fall back to ~4 MiB blocks (ragged tail masked by cdiv).
            half_rows = _round_up(pl.cdiv(rows, 2), row_align)
            tile_rows = min(max_tile_rows, half_rows)
    else:
        # Ragged tail (< 128 lanes): one block equal to the full array shape,
        # which is always layout-legal.
        tile_rows = rows

    grid = (pl.cdiv(rows, tile_rows),)
    block_bytes = tile_rows * cols * itemsize

    compiler_kwargs = dict(dimension_semantics=("parallel",))
    # 2x in + 2x out double-buffered blocks; only override the scoped-VMEM
    # limit when the footprint would not fit v5e's 16 MiB default.
    footprint = 4 * block_bytes + (4 << 20)
    if footprint > _DEFAULT_SCOPED_VMEM:
        compiler_kwargs["vmem_limit_bytes"] = int(footprint)

    n = rows * cols
    return pl.pallas_call(
        kernel,
        out_shape=jax.ShapeDtypeStruct((rows, cols), dtype),
        grid_spec=pltpu.PrefetchScalarGridSpec(
            num_scalar_prefetch=0,
            grid=grid,
            in_specs=[pl.BlockSpec((tile_rows, cols), lambda i: (i, 0))],
            out_specs=pl.BlockSpec((tile_rows, cols), lambda i: (i, 0)),
        ),
        compiler_params=pltpu.CompilerParams(**compiler_kwargs),
        cost_estimate=pl.CostEstimate(
            flops=8 * n,
            transcendentals=2 * n,
            bytes_accessed=2 * n * itemsize,
        ),
    )(slab)


@jax.jit
def mish(x: jax.Array) -> jax.Array:
    """Elementwise Mish over an arbitrarily shaped array (NCHW expected)."""
    orig_shape = x.shape
    n = x.size
    if n == 0:
        return x
    flat = x.reshape(-1)                 # contiguous reshape: free under jit

    n_main = (n // LANE) * LANE          # 128-aligned prefix
    rem = n - n_main                     # < 128 leftover elements

    pieces = []
    if n_main:
        pieces.append(_mish_slab(flat[:n_main].reshape(-1, LANE)).reshape(-1))
    if rem:
        pieces.append(_mish_slab(flat[n_main:].reshape(1, rem)).reshape(-1))
    out = pieces[0] if len(pieces) == 1 else jnp.concatenate(pieces)
    return out.reshape(orig_shape)


def _mish_ref(x):
    # Pure-JAX reference (stable softplus) computed in f32.
    xf = x.astype(jnp.float32)
    return xf * jnp.tanh(jax.nn.softplus(xf))


if __name__ == "__main__":
    key = jax.random.PRNGKey(0)

    # Primary check: f32 NCHW activation (batch=2, channels=4, 16x16 spatial).
    x = jax.random.normal(key, (2, 4, 16, 16), dtype=jnp.float32) * 3.0
    y = mish(x)
    jax.block_until_ready(y)
    assert y.shape == x.shape and y.dtype == x.dtype
    assert jnp.allclose(y, _mish_ref(x), atol=1e-5, rtol=1e-5)

    # Large-|x| saturation + tiny ragged (non lane-aligned) shape check.
    x_ext = jnp.array([-100.0, -20.0, -5.0, 0.0, 5.0, 20.0, 100.0],
                      dtype=jnp.float32)
    y_ext = mish(x_ext)
    jax.block_until_ready(y_ext)
    assert y_ext.shape == x_ext.shape
    assert jnp.allclose(y_ext, _mish_ref(x_ext), atol=1e-5, rtol=1e-5)

    # Ragged shape with a 128-aligned prefix + <128 tail (prefix+tail path).
    x_rag = jax.random.normal(key, (3, 5, 7, 11), dtype=jnp.float32) * 2.0
    y_rag = mish(x_rag)
    jax.block_until_ready(y_rag)
    assert y_rag.shape == x_rag.shape
    assert jnp.allclose(y_rag, _mish_ref(x_rag), atol=1e-5, rtol=1e-5)

    # Medium slab (> 1 MiB) to exercise the >= 2-block (dual-TC) tiling path.
    x_med = jax.random.normal(key, (4, 32, 64, 64), dtype=jnp.float32)
    y_med = mish(x_med)
    jax.block_until_ready(y_med)
    assert y_med.shape == x_med.shape
    assert jnp.allclose(y_med, _mish_ref(x_med), atol=1e-5, rtol=1e-5)

    # bf16 I/O: native-dtype DMA, f32 compute, approx reciprocal inside kernel.
    xb = (jax.random.normal(key, (2, 4, 16, 16), dtype=jnp.float32) * 3.0
          ).astype(jnp.bfloat16)
    yb = mish(xb)
    jax.block_until_ready(yb)
    assert yb.dtype == jnp.bfloat16 and yb.shape == xb.shape
    assert jnp.allclose(yb.astype(jnp.float32), _mish_ref(xb),
                        atol=2e-2, rtol=2e-2)

    print("KERNEL_OK")
</pallas_src>

<mosaic_0001>
module attributes {stable_mosaic.version = 11 : i64} {
  func.func @_mish_kernel(%arg0: i32, %arg1: memref<16x128xf32, #tpu.memory_space<vmem>>, %arg2: memref<16x128xf32, #tpu.memory_space<vmem>>) attributes {dimension_semantics = [#tpu.dimension_semantics<parallel>], iteration_bounds = array<i64: 1>, scalar_prefetch = 0 : i64, scratch_operands = 0 : i64, tpu.core_type = #tpu.core_type<tc>, window_params = [{transform_indices = @transform_0, window_bounds = array<i64: 16, 128>}, {transform_indices = @transform_1, window_bounds = array<i64: 16, 128>}]} {
    %c0 = arith.constant 0 : index
    %c0_0 = arith.constant 0 : index
    %0 = vector.load %arg1[%c0, %c0_0] : memref<16x128xf32, #tpu.memory_space<vmem>>, vector<16x128xf32>
    %cst = arith.constant 4.000000e+01 : f32
    %1 = vector.broadcast %cst : f32 to vector<16x128xf32>
    %2 = arith.minimumf %0, %1 : vector<16x128xf32>
    %3 = math.exp %2 : vector<16x128xf32>
    %cst_1 = arith.constant 2.000000e+00 : f32
    %4 = vector.broadcast %cst_1 : f32 to vector<16x128xf32>
    %5 = arith.addf %3, %4 : vector<16x128xf32>
    %6 = arith.mulf %3, %5 : vector<16x128xf32>
    %cst_2 = arith.constant 1.000000e+00 : f32
    %7 = vector.broadcast %cst_2 : f32 to vector<16x128xf32>
    %8 = arith.addf %7, %3 : vector<16x128xf32>
    %cst_3 = arith.constant 1.000000e+00 : f32
    %9 = vector.broadcast %cst_3 : f32 to vector<16x128xf32>
    %10 = arith.addf %9, %3 : vector<16x128xf32>
    %11 = arith.mulf %8, %10 : vector<16x128xf32>
    %cst_4 = arith.constant 1.000000e+00 : f32
    %12 = vector.broadcast %cst_4 : f32 to vector<16x128xf32>
    %13 = arith.addf %11, %12 : vector<16x128xf32>
    %14 = tpu.reciprocal %13 : vector<16x128xf32> -> vector<16x128xf32>
    %15 = arith.mulf %6, %14 : vector<16x128xf32>
    %16 = arith.mulf %0, %15 : vector<16x128xf32>
    %c0_5 = arith.constant 0 : index
    %c0_6 = arith.constant 0 : index
    %17 = vector.load %arg2[%c0_5, %c0_6] : memref<16x128xf32, #tpu.memory_space<vmem>>, vector<16x128xf32>
    tpu.vector_store %arg2[%c0_5, %c0_6], %16 {strides = array<i32>} : memref<16x128xf32, #tpu.memory_space<vmem>>, vector<16x128xf32>,
    return
  }
  func.func @transform_0(%arg0: i32) -> (i32, i32) {
    %c0_i32 = arith.constant 0 : i32
    %c0_i32_0 = arith.constant 0 : i32
    return %arg0, %c0_i32 : i32, i32
  }
  func.func @transform_1(%arg0: i32) -> (i32, i32) {
    %c0_i32 = arith.constant 0 : i32
    %c0_i32_0 = arith.constant 0 : i32
    return %arg0, %c0_i32 : i32, i32
  }
}

</mosaic_0001>

<bundles_post_ra>
// kernel: mish.1
= control target key start
LH: loop header
LB: loop body
LE: loop exit
PB: predicated region body
PF: predicated region fallthrough
CT: control target
= control target key end

     0   :  { %s94_s0 = inlined_call_operand.vmem [shape: f32[16,128], index: 0, kind: input, shape index: {}]   ;;  %s95_s1 = inlined_call_operand.vmem [shape: f32[16,128], index: 1, kind: output, shape index: {}]  }
   0x1   :  { %v8_v0 = vld [vmem:[%s94_s0] sm:$0xff]  ;;  %v9_v1 = vld [vmem:[%s94_s0 + $0x8] sm:$0xff] }
   0x2   :  { %v10_v2 = vmin.f32 %v8_v0, 40.0  ;;  %v11_v3 = vmin.f32 %v9_v1, 40.0 }
   0x4   :  { %v12_v4 = vmul.f32 1.442695, %v10_v2  ;;  %v14_v5 = vmul.f32 1.442695, %v11_v3 }
   0x6   :  { %64 = vpow2.f32 %v12_v4 }
   0x7   :  { %66 = vpow2.f32 %v14_v5 }
   0xc   :  { %v65_v6 = vpop.eup %64 }
   0xd   :  { %v67_v7 = vpop.eup %66  ;;  %v20_v8 = vadd.f32 1.0, %v65_v6  ;;  %v16_v16 = vadd.f32 2.0, %v65_v6 }
   0xe   :  { %v21_v9 = vadd.f32 1.0, %v67_v7  ;;  %v17_v19 = vadd.f32 2.0, %v67_v7 }
   0xf   :  { %v22_v10 = vmul.f32 %v20_v8, %v20_v8  ;;  %v18_v29 = vmul.f32 %v65_v6, %v16_v16 }
  0x10   :  { %v23_v11 = vmul.f32 %v21_v9, %v21_v9  ;;  %v19_v32 = vmul.f32 %v67_v7, %v17_v19 }
  0x11   :  { %v24_v12 = vadd.f32 1.0, %v22_v10 }
  0x12   :  { %v25_v13 = vadd.f32 1.0, %v23_v11 }
  0x13   :  { %68 = vrcp.f32 %v24_v12  ;;  %vm31_vm0 = vweird.f32 %v24_v12  ;;  %v37_v18 = vand.u32 2147483648, %v24_v12  ;;  %v35_v22 = vand.u32 2147483647, %v24_v12 }
  0x14   :  { %70 = vrcp.f32 %v25_v13  ;;  %v51_v23 = vand.u32 2147483648, %v25_v13  ;;  %vm45_vm2 = vweird.f32 %v25_v13  ;;  %v49_v25 = vand.u32 2147483647, %v25_v13 }
  0x15   :  { %v38_v27 = vor.u32 1.1754944e-38, %v37_v18  ;;  %vm36_vm5 = vcmp.eq.f32.partialorder %v35_v22, 8.507059e+37 }
  0x16   :  { %v52_v31 = vor.u32 1.1754944e-38, %v51_v23  ;;  %vm50_vm7 = vcmp.eq.f32.partialorder %v49_v25, 8.507059e+37 }
  0x19   :  { %v69_v14 = vpop.eup %68 }
  0x1a   :  { %v71_v15 = vpop.eup %70  ;;  %v27_v17 = vmul.f32 %v69_v14, %v24_v12  ;;  %vm32_vm1 = vweird.f32 %v69_v14 }
  0x1b   :  { %v41_v20 = vmul.f32 %v71_v15, %v25_v13  ;;  %vm46_vm3 = vweird.f32 %v71_v15  ;;  %vm33_vm4 = vmor %vm31_vm0, %vm32_vm1 }
  0x1c   :  { %v28_v21 = vsub.f32 1.0, %v27_v17  ;;  %vm47_vm6 = vmor %vm45_vm2, %vm46_vm3 }
  0x1d   :  { %v42_v24 = vsub.f32 1.0, %v41_v20 }
  0x1e   :  { %v29_v26 = vmul.f32 %v69_v14, %v28_v21 }
  0x1f   :  { %v43_v28 = vmul.f32 %v71_v15, %v42_v24 }
  0x20   :  { %v30_v30 = vadd.f32 %v69_v14, %v29_v26 }
  0x21   :  { %v44_v33 = vadd.f32 %v71_v15, %v43_v28 }
  0x22   :  { %v34_v34 = vsel %vm33_vm4, %v69_v14, %v30_v30 }
  0x23   :  { %v39_v35 = vsel %vm36_vm5, %v38_v27, %v34_v34  ;;  %v48_v36 = vsel %vm47_vm6, %v71_v15, %v44_v33 }
  0x24   :  { %v54_v37 = vmul.f32 %v39_v35, %v18_v29  ;;  %v53_v38 = vsel %vm50_vm7, %v52_v31, %v48_v36 }
  0x25   :  { %v55_v39 = vmul.f32 %v53_v38, %v19_v32 }
  0x26   :  { %v56_v40 = vmul.f32 %v54_v37, %v8_v0 }
  0x27   :  { %v57_v41 = vmul.f32 %v55_v39, %v9_v1 }
  0x28   :  { %58 = vst [vmem:[%s95_s1] sm:$0xff] %v56_v40 }
  0x29   :  { %59 = vst [vmem:[%s95_s1 + $0x8] sm:$0xff] %v57_v41 }

</bundles_post_ra>
